<compile_context>
chip_gen: v7x
topology: tpu7x:2x2x1
jax: 0.10.0
libtpu: 0.0.40
codegen_flags: <defaults>
</compile_context>

<pallas_src>
import jax
import jax.numpy as jnp
import numpy as np
from jax.experimental import pallas as pl
from jax.experimental.pallas import tpu as pltpu

# ----------------------------- model sizes (small) ---------------------------
VOCAB = 64          # output_dim = len(en_vocab)   (small synthetic vocab)
EMB = 32            # embedding_dim
ENC_H = 32          # encoder_hidden_dim
DEC_H = 32          # decoder_hidden_dim
SEQ = 8             # encoder source length
BATCH = 4           # batch size

LANE = 128          # lane-alignment granularity for fused-weight segments


def _round_up(x, m):
    return ((x + m - 1) // m) * m


# ------------------------------ Pallas kernel --------------------------------
def attention_decoder_kernel(
    ids_ref,      # (B, 1)        int32  decoder input tokens
    hidden_ref,   # (B, Hd)       f32    previous decoder hidden
    enc_ref,      # (S*B, 2He)    f32    encoder outputs, row j = s*B + b
    w_hcat_ref,   # (Hd, PAD+3Hd) f32    [attn hidden proj pad->PAD | W_hh^T]
    b_hcat_ref,   # (1, PAD+3Hd)  f32    [b_attn pad               | b_hh  ]
    t_emb_ref,    # (V, PAD+V)    f32    embedding @ [W_ih emb^T pad | fc_out emb^T] + [b_ih | b_out]
    w_ae_ref,     # (2He, Hd)     f32    attn_fc encoder part, pre-transposed
    v_wide_ref,   # (Hd, S)       f32    v_fc weight broadcast along lanes
    w_wcat_ref,   # (2He, PAD+V)  f32    [W_ih ctx^T pad | fc_out ctx^T]
    w_fco_ref,    # (Hd, V)       f32    fc_out output/hidden part
    out_ref,      # (B, OUT_W)    f32    packed [pred V | h_new Hd | attn S | 0]
):
    f32 = jnp.float32
    B, Hd = hidden_ref.shape
    SB, _ = enc_ref.shape
    S = SB // B
    V = w_fco_ref.shape[1]
    G = 3 * Hd
    PAD = w_hcat_ref.shape[1] - G     # lane-aligned start of 2nd fused segment
    PAD2 = w_wcat_ref.shape[1] - V

    # B is a power of two (asserted in the wrapper) -> shifts/ands only.
    b_shift = B.bit_length() - 1
    b_mask = B - 1

    def iota(shape, dim):
        return jax.lax.broadcasted_iota(jnp.int32, shape, dim)

    # Constant 0/1 selector matrices (pure VPU iota/compare work; they feed the
    # MXU so no XLU shuffles, repeats or per-s slice loops are needed).
    sel_b = ((iota((SB, B), 0) & b_mask) == iota((SB, B), 1)).astype(f32)    # j%B==b
    sel_bt = ((iota((B, SB), 1) & b_mask) == iota((B, SB), 0)).astype(f32)   # j%B==b
    sel_s = ((iota((SB, S), 0) >> b_shift) == iota((SB, S), 1)).astype(f32)  # j//B==s
    sel_st = ((iota((S, SB), 1) >> b_shift) == iota((S, SB), 0)).astype(f32) # j//B==s

    hidden = hidden_ref[...]                                            # (B, Hd)
    enc = enc_ref[...]                                                  # (SB, 2He)

    # ---- embedding fold: one-hot(ids) @ T_emb (gi_emb | pred_emb, biases folded)
    onehot = (iota((B, V), 1) == ids_ref[...]).astype(f32)              # (B, V)
    embcat = jnp.dot(onehot, t_emb_ref[...], preferred_element_type=f32)  # (B, PAD+V)

    # ---- fused hidden projections: [attention proj | GRU gh] ---------------
    hcat = (jnp.dot(hidden, w_hcat_ref[...], preferred_element_type=f32)
            + b_hcat_ref[...])                                          # (B, PAD+3Hd)
    h_proj = hcat[:, :Hd]                                               # incl. b_attn
    gh = hcat[:, PAD:PAD + G]                                           # incl. b_hh

    # ---- attention energies: tanh(W_a[h ; enc]) -----------------------------
    e_proj = jnp.dot(enc, w_ae_ref[...], preferred_element_type=f32)    # (SB, Hd)
    h_tiled = jnp.dot(sel_b, h_proj, preferred_element_type=f32)        # (SB, Hd)
    energy = jnp.tanh(e_proj + h_tiled)                                 # one EUP pass

    # ---- scores -> (B, S) via MXU relayout ----------------------------------
    t = jnp.dot(energy, v_wide_ref[...], preferred_element_type=f32)    # (SB, S), cols identical
    scores = jnp.dot(sel_bt, t * sel_s, preferred_element_type=f32)     # (B, S)

    # softmax over source length (lanes)
    scores = scores - jnp.max(scores, axis=1, keepdims=True)
    p = jnp.exp(scores)
    a = p / jnp.sum(p, axis=1, keepdims=True)                           # (B, S)

    # ---- weighted context: weighted[b] = sum_s a[b,s] * enc[s*B+b] as 1 matmul
    a_rep = jnp.dot(a, sel_st, preferred_element_type=f32)              # (B, SB): a[b, j//B]
    weighted = jnp.dot(a_rep * sel_bt, enc, preferred_element_type=f32) # (B, 2He)

    # ---- fused context projections accumulated onto the embedding ones ------
    mix = embcat + jnp.dot(weighted, w_wcat_ref[...],
                           preferred_element_type=f32)                  # (B, PAD+V)
    gi = mix[:, :G]                                                     # incl. b_ih
    pred_ew = mix[:, PAD2:PAD2 + V]                                     # incl. b_out

    # ---- single-step GRU cell (gates ordered [r, z, n]) ---------------------
    rz = jax.nn.sigmoid(gi[:, :2 * Hd] + gh[:, :2 * Hd])                # fused sigmoid
    r = rz[:, :Hd]
    z = rz[:, Hd:]
    n = jnp.tanh(gi[:, 2 * Hd:] + r * gh[:, 2 * Hd:])
    h_new = (1.0 - z) * n + z * hidden                                  # == output

    # ---- output projection + single lane-dense packed store -----------------
    pred = (jnp.dot(h_new, w_fco_ref[...], preferred_element_type=f32) + pred_ew)
    pieces = [pred, h_new, a]
    tail = out_ref.shape[1] - (V + Hd + S)
    if tail > 0:
        pieces.append(jnp.zeros((B, tail), f32))
    out_ref[...] = jnp.concatenate(pieces, axis=1)


# ------------------------------ wrapper ---------------------------------------
@jax.jit
def attention_decoder(input_ids, hidden, encoder_outputs, kp):
    """input_ids (B,) int32, hidden (B,Hd) f32, encoder_outputs (S,B,2He) f32.

    Returns (prediction (B,V), new_hidden (B,Hd), attention (B,S)).
    """
    S, B, He2 = encoder_outputs.shape
    Hd = hidden.shape[1]
    V = kp["w_fco"].shape[1]
    assert B & (B - 1) == 0, "kernel selector masks assume power-of-two batch"
    out_w = _round_up(V + Hd + S, LANE)

    enc_flat = encoder_outputs.reshape(S * B, He2)     # free bitcast: row j = s*B + b
    ids2d = input_ids.reshape(B, 1).astype(jnp.int32)

    vmem = pl.BlockSpec(memory_space=pltpu.MemorySpace.VMEM)

    packed = pl.pallas_call(
        attention_decoder_kernel,
        out_shape=jax.ShapeDtypeStruct((B, out_w), jnp.float32),
        in_specs=[vmem] * 10,
        out_specs=vmem,
    )(ids2d, hidden, enc_flat,
      kp["w_hcat"], kp["b_hcat"], kp["t_emb"],
      kp["w_ae"], kp["v_wide"], kp["w_wcat"], kp["w_fco"])

    pred = packed[:, :V]
    hid = packed[:, V:V + Hd]
    attn = packed[:, V + Hd:V + Hd + S]
    return pred, hid, attn


# --------------------------- param init & packing -----------------------------
def init_raw_params(key):
    """PyTorch-layout parameters (weights are (out_features, in_features))."""
    ks = jax.random.split(key, 10)

    def u(k, shape, fan_in):
        s = 1.0 / np.sqrt(fan_in)
        return jax.random.uniform(k, shape, jnp.float32, -s, s)

    attn_in = 2 * ENC_H + DEC_H
    rnn_in = 2 * ENC_H + EMB
    fc_in = 2 * ENC_H + DEC_H + EMB
    return {
        "embedding": jax.random.normal(ks[0], (VOCAB, EMB), jnp.float32),
        # Attention: attn_fc Linear(2He+Hd -> Hd), v_fc Linear(Hd -> 1, no bias)
        "attn_w": u(ks[1], (DEC_H, attn_in), attn_in),
        "attn_b": u(ks[2], (DEC_H,), attn_in),
        "v_w":    u(ks[3], (1, DEC_H), DEC_H),
        # GRU(rnn_in -> Hd), gates [r, z, n]
        "w_ih":   u(ks[4], (3 * DEC_H, rnn_in), DEC_H),
        "w_hh":   u(ks[5], (3 * DEC_H, DEC_H), DEC_H),
        "b_ih":   u(ks[6], (3 * DEC_H,), DEC_H),
        "b_hh":   u(ks[7], (3 * DEC_H,), DEC_H),
        # fc_out: Linear(Hd + 2He + E -> V)
        "fc_w":   u(ks[8], (VOCAB, fc_in), fc_in),
        "fc_b":   u(ks[9], (VOCAB,), fc_in),
    }


def pack_params(raw, seq_len):
    """One-time re-layout: transposes, 128-lane segment padding, bias folds and
    the embedding-table fold (T_emb) all happen here, never per call."""
    E = raw["embedding"].shape[1]
    Hd = raw["w_hh"].shape[1]
    He2 = raw["attn_w"].shape[1] - Hd          # 2 * encoder_hidden_dim
    V = raw["fc_w"].shape[0]
    G = 3 * Hd
    PAD = _round_up(max(Hd, G), LANE)          # lane-aligned start of 2nd segment
    assert G <= PAD

    attn_w = raw["attn_w"]                     # cat order: [hidden | enc_out]
    w_ih = raw["w_ih"]                         # cat order: [embedded | weighted]
    fc_w = raw["fc_w"]                         # cat order: [output | weighted | embedded]

    def pad_to(x, width):
        return jnp.pad(x, ((0, 0), (0, width - x.shape[1])))

    # hidden-side fused weights/bias: [attn hidden proj pad->PAD | W_hh^T]
    w_hcat = jnp.concatenate([pad_to(attn_w[:, :Hd].T, PAD), raw["w_hh"].T], axis=1)
    b_hcat = jnp.concatenate([pad_to(raw["attn_b"].reshape(1, -1), PAD),
                              raw["b_hh"].reshape(1, -1)], axis=1)

    # embedding-side fused weights FOLDED through the embedding table,
    # with b_ih / b_out folded in (exact because one-hot rows sum to 1).
    w_embcat = jnp.concatenate([pad_to(w_ih[:, :E].T, PAD),
                                fc_w[:, Hd + He2:].T], axis=1)           # (E, PAD+V)
    b_fold = jnp.concatenate([pad_to(raw["b_ih"].reshape(1, -1), PAD),
                              raw["fc_b"].reshape(1, -1)], axis=1)       # (1, PAD+V)
    t_emb = raw["embedding"] @ w_embcat + b_fold                         # (V, PAD+V)

    # context-side fused weights: [W_ih ctx^T pad->PAD | fc_out ctx^T]
    w_wcat = jnp.concatenate([pad_to(w_ih[:, E:].T, PAD),
                              fc_w[:, Hd:Hd + He2].T], axis=1)           # (2He, PAD+V)

    v_wide = jnp.broadcast_to(raw["v_w"].T, (Hd, seq_len)).astype(jnp.float32)

    return {
        "w_hcat": w_hcat,                    # (Hd, PAD+3Hd)
        "b_hcat": b_hcat,                    # (1, PAD+3Hd)
        "t_emb": t_emb,                      # (V, PAD+V)
        "w_ae": attn_w[:, Hd:].T,            # (2He, Hd)
        "v_wide": v_wide,                    # (Hd, S)
        "w_wcat": w_wcat,                    # (2He, PAD+V)
        "w_fco": fc_w[:, :Hd].T,             # (Hd, V)
    }


# --------------------------- pure-JAX reference -------------------------------
def reference(input_ids, hidden, encoder_outputs, raw):
    emb = raw["embedding"][input_ids]                            # (B, E)
    S, B, _ = encoder_outputs.shape
    Hd = hidden.shape[1]

    # Attention.forward
    enc_p = jnp.transpose(encoder_outputs, (1, 0, 2))            # (B, S, 2He)
    hid_rep = jnp.broadcast_to(hidden[:, None, :], (B, S, Hd))
    energy = jnp.tanh(
        jnp.concatenate([hid_rep, enc_p], axis=2) @ raw["attn_w"].T + raw["attn_b"])
    scores = (energy @ raw["v_w"].T)[..., 0]                     # (B, S)
    a = jax.nn.softmax(scores, axis=1)

    # AttentionDecoder.forward
    weighted = jnp.einsum("bs,bse->be", a, enc_p)                # (B, 2He)
    x = jnp.concatenate([emb, weighted], axis=1)
    gi = x @ raw["w_ih"].T + raw["b_ih"]
    gh = hidden @ raw["w_hh"].T + raw["b_hh"]
    r = jax.nn.sigmoid(gi[:, :Hd] + gh[:, :Hd])
    z = jax.nn.sigmoid(gi[:, Hd:2 * Hd] + gh[:, Hd:2 * Hd])
    n = jnp.tanh(gi[:, 2 * Hd:] + r * gh[:, 2 * Hd:])
    h_new = (1.0 - z) * n + z * hidden
    pred = (jnp.concatenate([h_new, weighted, emb], axis=1) @ raw["fc_w"].T
            + raw["fc_b"])
    return pred, h_new, a


# ------------------------------------ main ------------------------------------
if __name__ == "__main__":
    key = jax.random.PRNGKey(0)
    kparam, kin, khid, kenc = jax.random.split(key, 4)

    raw = init_raw_params(kparam)
    packed = pack_params(raw, SEQ)

    input_ids = jax.random.randint(kin, (BATCH,), 0, VOCAB, dtype=jnp.int32)
    hidden = jax.random.normal(khid, (BATCH, DEC_H), jnp.float32)
    encoder_outputs = jax.random.normal(kenc, (SEQ, BATCH, 2 * ENC_H), jnp.float32)

    pred, hid, attn = attention_decoder(input_ids, hidden, encoder_outputs, packed)
    jax.block_until_ready((pred, hid, attn))

    r_pred, r_hid, r_attn = reference(input_ids, hidden, encoder_outputs, raw)
    np.testing.assert_allclose(np.asarray(pred), np.asarray(r_pred), rtol=1e-5, atol=1e-5)
    np.testing.assert_allclose(np.asarray(hid), np.asarray(r_hid), rtol=1e-5, atol=1e-5)
    np.testing.assert_allclose(np.asarray(attn), np.asarray(r_attn), rtol=1e-5, atol=1e-5)

    assert pred.shape == (BATCH, VOCAB)
    assert hid.shape == (BATCH, DEC_H)
    assert attn.shape == (BATCH, SEQ)
    print("KERNEL_OK")
</pallas_src>

<mosaic_0001>
module attributes {stable_mosaic.version = 11 : i64} {
  func.func @attention_decoder_kernel(%arg0: memref<4x1xi32, #tpu.memory_space<vmem>>, %arg1: memref<4x32xf32, #tpu.memory_space<vmem>>, %arg2: memref<32x64xf32, #tpu.memory_space<vmem>>, %arg3: memref<32x224xf32, #tpu.memory_space<vmem>>, %arg4: memref<1x224xf32, #tpu.memory_space<vmem>>, %arg5: memref<64x192xf32, #tpu.memory_space<vmem>>, %arg6: memref<64x32xf32, #tpu.memory_space<vmem>>, %arg7: memref<32x8xf32, #tpu.memory_space<vmem>>, %arg8: memref<64x192xf32, #tpu.memory_space<vmem>>, %arg9: memref<32x64xf32, #tpu.memory_space<vmem>>, %arg10: memref<4x128xf32, #tpu.memory_space<vmem>>) attributes {dimension_semantics = [], scalar_prefetch = 0 : i64, scratch_operands = 0 : i64, tpu.core_type = #tpu.core_type<tc>} {
    %0 = tpu.iota {dimensions = array<i32: 0>} : vector<32x4xi32>
    %c3_i32 = arith.constant 3 : i32
    %1 = vector.broadcast %c3_i32 : i32 to vector<32x4xi32>
    %2 = arith.andi %0, %1 : vector<32x4xi32>
    %3 = tpu.iota {dimensions = array<i32: 1>} : vector<32x4xi32>
    %4 = arith.cmpi eq, %2, %3 : vector<32x4xi32>
    %5 = arith.extui %4 : vector<32x4xi1> to vector<32x4xi32>
    %6 = arith.sitofp %5 : vector<32x4xi32> to vector<32x4xf32>
    %7 = tpu.iota {dimensions = array<i32: 1>} : vector<4x32xi32>
    %c3_i32_0 = arith.constant 3 : i32
    %8 = vector.broadcast %c3_i32_0 : i32 to vector<4x32xi32>
    %9 = arith.andi %7, %8 : vector<4x32xi32>
    %10 = tpu.iota {dimensions = array<i32: 0>} : vector<4x32xi32>
    %11 = arith.cmpi eq, %9, %10 : vector<4x32xi32>
    %12 = arith.extui %11 : vector<4x32xi1> to vector<4x32xi32>
    %13 = arith.sitofp %12 : vector<4x32xi32> to vector<4x32xf32>
    %14 = tpu.iota {dimensions = array<i32: 0>} : vector<32x8xi32>
    %c2_i32 = arith.constant 2 : i32
    %15 = vector.broadcast %c2_i32 : i32 to vector<32x8xi32>
    %16 = arith.shrsi %14, %15 : vector<32x8xi32>
    %17 = tpu.iota {dimensions = array<i32: 1>} : vector<32x8xi32>
    %18 = arith.cmpi eq, %16, %17 : vector<32x8xi32>
    %19 = arith.extui %18 : vector<32x8xi1> to vector<32x8xi32>
    %20 = arith.sitofp %19 : vector<32x8xi32> to vector<32x8xf32>
    %21 = tpu.iota {dimensions = array<i32: 1>} : vector<8x32xi32>
    %c2_i32_1 = arith.constant 2 : i32
    %22 = vector.broadcast %c2_i32_1 : i32 to vector<8x32xi32>
    %23 = arith.shrsi %21, %22 : vector<8x32xi32>
    %24 = tpu.iota {dimensions = array<i32: 0>} : vector<8x32xi32>
    %25 = arith.cmpi eq, %23, %24 : vector<8x32xi32>
    %26 = arith.extui %25 : vector<8x32xi1> to vector<8x32xi32>
    %27 = arith.sitofp %26 : vector<8x32xi32> to vector<8x32xf32>
    %c0 = arith.constant 0 : index
    %c0_2 = arith.constant 0 : index
    %28 = vector.load %arg1[%c0, %c0_2] : memref<4x32xf32, #tpu.memory_space<vmem>>, vector<4x32xf32>
    %c0_3 = arith.constant 0 : index
    %c0_4 = arith.constant 0 : index
    %29 = vector.load %arg2[%c0_3, %c0_4] : memref<32x64xf32, #tpu.memory_space<vmem>>, vector<32x64xf32>
    %30 = tpu.iota {dimensions = array<i32: 1>} : vector<4x64xi32>
    %c0_5 = arith.constant 0 : index
    %c0_6 = arith.constant 0 : index
    %31 = vector.load %arg0[%c0_5, %c0_6] : memref<4x1xi32, #tpu.memory_space<vmem>>, vector<4x1xi32>
    %32 = vector.broadcast %31 : vector<4x1xi32> to vector<4x64xi32>
    %33 = arith.cmpi eq, %30, %32 : vector<4x64xi32>
    %34 = arith.extui %33 : vector<4x64xi1> to vector<4x64xi32>
    %35 = arith.sitofp %34 : vector<4x64xi32> to vector<4x64xf32>
    %c0_7 = arith.constant 0 : index
    %c0_8 = arith.constant 0 : index
    %36 = vector.load %arg5[%c0_7, %c0_8] : memref<64x192xf32, #tpu.memory_space<vmem>>, vector<64x192xf32>
    %cst = arith.constant dense<0.000000e+00> : vector<4x192xf32>
    %37 = tpu.matmul %35, %36, %cst {dimension_numbers = #tpu.dot_dimension_numbers<[1], [0], [0], [1], [0, 0, 1, 1], [], []>} : vector<4x64xf32>, vector<64x192xf32>, vector<4x192xf32> -> vector<4x192xf32>
    %c0_9 = arith.constant 0 : index
    %c0_10 = arith.constant 0 : index
    %38 = vector.load %arg3[%c0_9, %c0_10] : memref<32x224xf32, #tpu.memory_space<vmem>>, vector<32x224xf32>
    %cst_11 = arith.constant dense<0.000000e+00> : vector<4x224xf32>
    %39 = tpu.matmul %28, %38, %cst_11 {dimension_numbers = #tpu.dot_dimension_numbers<[1], [0], [0], [1], [0, 0, 1, 1], [], []>} : vector<4x32xf32>, vector<32x224xf32>, vector<4x224xf32> -> vector<4x224xf32>
    %c0_12 = arith.constant 0 : index
    %c0_13 = arith.constant 0 : index
    %40 = vector.load %arg4[%c0_12, %c0_13] : memref<1x224xf32, #tpu.memory_space<vmem>>, vector<1x224xf32>
    %41 = vector.broadcast %40 : vector<1x224xf32> to vector<4x224xf32>
    %42 = arith.addf %39, %41 : vector<4x224xf32>
    %43 = vector.extract_strided_slice %42 {offsets = [0, 0], sizes = [4, 32], strides = [1, 1]} : vector<4x224xf32> to vector<4x32xf32>
    %44 = vector.extract_strided_slice %42 {offsets = [0, 128], sizes = [4, 96], strides = [1, 1]} : vector<4x224xf32> to vector<4x96xf32>
    %c0_14 = arith.constant 0 : index
    %c0_15 = arith.constant 0 : index
    %45 = vector.load %arg6[%c0_14, %c0_15] : memref<64x32xf32, #tpu.memory_space<vmem>>, vector<64x32xf32>
    %cst_16 = arith.constant dense<0.000000e+00> : vector<32x32xf32>
    %46 = tpu.matmul %29, %45, %cst_16 {dimension_numbers = #tpu.dot_dimension_numbers<[1], [0], [0], [1], [0, 0, 1, 1], [], []>} : vector<32x64xf32>, vector<64x32xf32>, vector<32x32xf32> -> vector<32x32xf32>
    %cst_17 = arith.constant dense<0.000000e+00> : vector<32x32xf32>
    %47 = tpu.matmul %6, %43, %cst_17 {dimension_numbers = #tpu.dot_dimension_numbers<[1], [0], [0], [1], [0, 0, 1, 1], [], []>} : vector<32x4xf32>, vector<4x32xf32>, vector<32x32xf32> -> vector<32x32xf32>
    %48 = arith.addf %46, %47 : vector<32x32xf32>
    %49 = math.tanh %48 : vector<32x32xf32>
    %c0_18 = arith.constant 0 : index
    %c0_19 = arith.constant 0 : index
    %50 = vector.load %arg7[%c0_18, %c0_19] : memref<32x8xf32, #tpu.memory_space<vmem>>, vector<32x8xf32>
    %cst_20 = arith.constant dense<0.000000e+00> : vector<32x8xf32>
    %51 = tpu.matmul %49, %50, %cst_20 {dimension_numbers = #tpu.dot_dimension_numbers<[1], [0], [0], [1], [0, 0, 1, 1], [], []>} : vector<32x32xf32>, vector<32x8xf32>, vector<32x8xf32> -> vector<32x8xf32>
    %52 = arith.mulf %51, %20 : vector<32x8xf32>
    %cst_21 = arith.constant dense<0.000000e+00> : vector<4x8xf32>
    %53 = tpu.matmul %13, %52, %cst_21 {dimension_numbers = #tpu.dot_dimension_numbers<[1], [0], [0], [1], [0, 0, 1, 1], [], []>} : vector<4x32xf32>, vector<32x8xf32>, vector<4x8xf32> -> vector<4x8xf32>
    %cst_22 = arith.constant dense<0xFF800000> : vector<4xf32>
    %54 = vector.multi_reduction <maximumf>, %53, %cst_22 [1] : vector<4x8xf32> to vector<4xf32>
    %55 = vector.shape_cast %54 : vector<4xf32> to vector<4x1xf32>
    %56 = vector.broadcast %55 : vector<4x1xf32> to vector<4x8xf32>
    %57 = arith.subf %53, %56 : vector<4x8xf32>
    %58 = math.exp %57 : vector<4x8xf32>
    %cst_23 = arith.constant dense<0.000000e+00> : vector<4xf32>
    %59 = vector.multi_reduction <add>, %58, %cst_23 [1] : vector<4x8xf32> to vector<4xf32>
    %60 = vector.shape_cast %59 : vector<4xf32> to vector<4x1xf32>
    %61 = vector.broadcast %60 : vector<4x1xf32> to vector<4x8xf32>
    %62 = arith.divf %58, %61 : vector<4x8xf32>
    %cst_24 = arith.constant dense<0.000000e+00> : vector<4x32xf32>
    %63 = tpu.matmul %62, %27, %cst_24 {dimension_numbers = #tpu.dot_dimension_numbers<[1], [0], [0], [1], [0, 0, 1, 1], [], []>} : vector<4x8xf32>, vector<8x32xf32>, vector<4x32xf32> -> vector<4x32xf32>
    %64 = arith.mulf %63, %13 : vector<4x32xf32>
    %cst_25 = arith.constant dense<0.000000e+00> : vector<4x64xf32>
    %65 = tpu.matmul %64, %29, %cst_25 {dimension_numbers = #tpu.dot_dimension_numbers<[1], [0], [0], [1], [0, 0, 1, 1], [], []>} : vector<4x32xf32>, vector<32x64xf32>, vector<4x64xf32> -> vector<4x64xf32>
    %c0_26 = arith.constant 0 : index
    %c0_27 = arith.constant 0 : index
    %66 = vector.load %arg8[%c0_26, %c0_27] : memref<64x192xf32, #tpu.memory_space<vmem>>, vector<64x192xf32>
    %cst_28 = arith.constant dense<0.000000e+00> : vector<4x192xf32>
    %67 = tpu.matmul %65, %66, %cst_28 {dimension_numbers = #tpu.dot_dimension_numbers<[1], [0], [0], [1], [0, 0, 1, 1], [], []>} : vector<4x64xf32>, vector<64x192xf32>, vector<4x192xf32> -> vector<4x192xf32>
    %68 = arith.addf %37, %67 : vector<4x192xf32>
    %69 = vector.extract_strided_slice %68 {offsets = [0, 0], sizes = [4, 96], strides = [1, 1]} : vector<4x192xf32> to vector<4x96xf32>
    %70 = vector.extract_strided_slice %68 {offsets = [0, 128], sizes = [4, 64], strides = [1, 1]} : vector<4x192xf32> to vector<4x64xf32>
    %71 = vector.extract_strided_slice %69 {offsets = [0, 0], sizes = [4, 64], strides = [1, 1]} : vector<4x96xf32> to vector<4x64xf32>
    %72 = vector.extract_strided_slice %44 {offsets = [0, 0], sizes = [4, 64], strides = [1, 1]} : vector<4x96xf32> to vector<4x64xf32>
    %73 = arith.addf %71, %72 : vector<4x64xf32>
    %74 = arith.negf %73 : vector<4x64xf32>
    %75 = math.exp %74 : vector<4x64xf32>
    %cst_29 = arith.constant 1.000000e+00 : f32
    %76 = vector.broadcast %cst_29 : f32 to vector<4x64xf32>
    %77 = arith.addf %76, %75 : vector<4x64xf32>
    %78 = arith.divf %76, %77 : vector<4x64xf32>
    %79 = vector.extract_strided_slice %78 {offsets = [0, 0], sizes = [4, 32], strides = [1, 1]} : vector<4x64xf32> to vector<4x32xf32>
    %80 = vector.extract_strided_slice %78 {offsets = [0, 32], sizes = [4, 32], strides = [1, 1]} : vector<4x64xf32> to vector<4x32xf32>
    %81 = vector.extract_strided_slice %69 {offsets = [0, 64], sizes = [4, 32], strides = [1, 1]} : vector<4x96xf32> to vector<4x32xf32>
    %82 = vector.extract_strided_slice %44 {offsets = [0, 64], sizes = [4, 32], strides = [1, 1]} : vector<4x96xf32> to vector<4x32xf32>
    %83 = arith.mulf %79, %82 : vector<4x32xf32>
    %84 = arith.addf %81, %83 : vector<4x32xf32>
    %85 = math.tanh %84 : vector<4x32xf32>
    %cst_30 = arith.constant 1.000000e+00 : f32
    %86 = vector.broadcast %cst_30 : f32 to vector<4x32xf32>
    %87 = arith.subf %86, %80 : vector<4x32xf32>
    %88 = arith.mulf %87, %85 : vector<4x32xf32>
    %89 = arith.mulf %80, %28 : vector<4x32xf32>
    %90 = arith.addf %88, %89 : vector<4x32xf32>
    %c0_31 = arith.constant 0 : index
    %c0_32 = arith.constant 0 : index
    %91 = vector.load %arg9[%c0_31, %c0_32] : memref<32x64xf32, #tpu.memory_space<vmem>>, vector<32x64xf32>
    %cst_33 = arith.constant dense<0.000000e+00> : vector<4x64xf32>
    %92 = tpu.matmul %90, %91, %cst_33 {dimension_numbers = #tpu.dot_dimension_numbers<[1], [0], [0], [1], [0, 0, 1, 1], [], []>} : vector<4x32xf32>, vector<32x64xf32>, vector<4x64xf32> -> vector<4x64xf32>
    %93 = arith.addf %92, %70 : vector<4x64xf32>
    %cst_34 = arith.constant 0.000000e+00 : f32
    %94 = vector.broadcast %cst_34 : f32 to vector<4x24xf32>
    %95 = tpu.concatenate %93, %90, %62, %94 in 1 : vector<4x64xf32>, vector<4x32xf32>, vector<4x8xf32>, vector<4x24xf32> -> vector<4x128xf32>
    %c0_35 = arith.constant 0 : index
    %c0_36 = arith.constant 0 : index
    %96 = vector.load %arg10[%c0_35, %c0_36] : memref<4x128xf32, #tpu.memory_space<vmem>>, vector<4x128xf32>
    tpu.vector_store %arg10[%c0_35, %c0_36], %95 {strides = array<i32>} : memref<4x128xf32, #tpu.memory_space<vmem>>, vector<4x128xf32>,
    return
  }
}

</mosaic_0001>

<bundles_post_ra>
// kernel: attention_decoder.1
= control target key start
LH: loop header
LB: loop body
LE: loop exit
PB: predicated region body
PF: predicated region fallthrough
CT: control target
= control target key end

     0   :  { %15 = vsyncpa [#allocation3], 0  ;;  %s1833_s0 = inlined_call_operand.vmem [shape: s32[4,1], index: 0, kind: input, shape index: {}]   ;;  %s1834_s1 = inlined_call_operand.vmem [shape: f32[4,32], index: 1, kind: input, shape index: {}]   ;;  %s1835_s2 = inlined_call_operand.hbm [shape: f32[32,64], index: 2, kind: input, shape index: {}]   ;;  %s1836_s3 = inlined_call_operand.hbm [shape: f32[32,224], index: 3, kind: input, shape index: {}]   ;;  %s1837_s4 = inlined_call_operand.vmem [shape: f32[1,224], index: 4, kind: input, shape index: {}]   ;;  %s1838_s5 = inlined_call_operand.vmem [shape: f32[64,192], index: 5, kind: input, shape index: {}]   ;;  %s1839_s6 = inlined_call_operand.vmem [shape: f32[64,32], index: 6, kind: input, shape index: {}]   ;;  %s1840_s7 = inlined_call_operand.vmem [shape: f32[32,8], index: 7, kind: input, shape index: {}]   ;;  %s1841_s8 = inlined_call_operand.hbm [shape: f32[64,192], index: 8, kind: input, shape index: {}]   ;;  %s1842_s9 = inlined_call_operand.hbm [shape: f32[32,64], index: 9, kind: input, shape index: {}]   ;;  %s1843_s10 = inlined_call_operand.vmem [shape: f32[4,128], index: 10, kind: output, shape index: {}]  }
   0x1   :  { %16 = vsyncpa [#allocation5], 0 }
   0x2   :  { %17 = vsyncpa [#allocation8], 0  ;;  %s1476_s13 = smov [#allocation4]   ;;  %s1382_s17 = scalar_lea.hbm %s1836_s3, 1024 }
   0x3   :  { %s39_s14 = sshll.u32 %s1476_s13, 4  ;;  %p1383_p0 = scmp.ne.s32.totalorder %s1836_s3, %s1382_s17  ;;  %s40_s14 = int_to_ptr.vmem [resolvable:$true] %s39_s14 }
   0x4   :  { %p1386_p1 = scmp.lt.u32.totalorder %s1382_s17, %s1836_s3 }
   0x6   :  { %p1388_p2 = pnand %p1386_p1, %p1383_p0 }
   0x8   :  { %1391 = shalt.err (!%p1388_p2)
}
   0x9   :  { %s1392_s22 = scalar_lea.vmem %s40_s14, 1024  ;;  %p1397_p4 = scmp.lt.s32.totalorder %s40_s14, %s40_s14 }
   0xa   :  { %p1393_p3 = scmp.ne.s32.totalorder %s40_s14, %s1392_s22  ;;  %p1398_p5 = scmp.lt.s32.totalorder %s1392_s22, %s1392_s22 }
   0xc   :  { %p1399_p6 = por %p1398_p5, %p1397_p4 }
   0xe   :  { %p1400_p7 = pnand %p1399_p6, %p1393_p3 }
  0x10   :  { %1403 = shalt.err (!%p1400_p7)
}
  0x11   :  { %s1477_s23 = smov 256   ;;  %s1478_s24 = smov 16  }
  0x12   :  { %45 = dma.hbm_to_vmem [thread:$0]  %s1836_s3, 1024, %s40_s14, [#allocation5], %s1477_s23, %s1477_s23, %s1478_s24  }
  0x13   :  { %s1479_s27 = smov [#allocation2]   ;;  %s1404_s11 = scalar_lea.hbm %s1835_s2, 512 }
  0x14   :  { %s27_s28 = sshll.u32 %s1479_s27, 4  ;;  %p1405_p8 = scmp.ne.s32.totalorder %s1835_s2, %s1404_s11  ;;  %s28_s28 = int_to_ptr.vmem [resolvable:$true] %s27_s28 }
  0x15   :  { %p1408_p9 = scmp.lt.u32.totalorder %s1404_s11, %s1835_s2 }
  0x17   :  { %p1410_p10 = pnand %p1408_p9, %p1405_p8 }
  0x19   :  { %1413 = shalt.err (!%p1410_p10)
}
  0x1a   :  { %s1414_s17 = scalar_lea.vmem %s28_s28, 512  ;;  %p1419_p12 = scmp.lt.s32.totalorder %s28_s28, %s28_s28 }
  0x1b   :  { %p1415_p11 = scmp.ne.s32.totalorder %s28_s28, %s1414_s17  ;;  %p1420_p13 = scmp.lt.s32.totalorder %s1414_s17, %s1414_s17 }
  0x1d   :  { %p1421_p0 = por %p1420_p13, %p1419_p12 }
  0x1f   :  { %p1422_p1 = pnand %p1421_p0, %p1415_p11 }
  0x21   :  { %1425 = shalt.err (!%p1422_p1)
}
  0x22   :  { %s1480_s3 = smov 128   ;;  %s1481_s14 = smov 8  }
  0x23   :  { %33 = dma.hbm_to_vmem [thread:$0]  %s1835_s2, 512, %s28_s28, [#allocation3], %s1480_s3, %s1480_s3, %s1481_s14  }
  0x24   :  { %s1482_s20 = smov [#allocation6]   ;;  %s1483_s22 = smov [#allocation7]  }
  0x25   :  { %s59_s21 = sshll.u32 %s1482_s20, 4  ;;  %s71_s25 = sshll.u32 %s1483_s22, 4  ;;  %s60_s21 = int_to_ptr.vmem [resolvable:$true] %s59_s21  ;;  %s1577_s25 = int_to_ptr.vmem [resolvable:$true] %s71_s25 }
  0x26   :  { %s1426_s29 = scalar_lea.hbm %s1841_s8, 2048 }
  0x27   :  { %p1427_p2 = scmp.ne.s32.totalorder %s1841_s8, %s1426_s29  ;;  %p1430_p3 = scmp.lt.u32.totalorder %s1426_s29, %s1841_s8 }
  0x29   :  { %p1432_p4 = pnand %p1430_p3, %p1427_p2 }
  0x2b   :  { %1435 = shalt.err (!%p1432_p4)
}
  0x2c   :  { %s1436_s2 = scalar_lea.vmem %s60_s21, 2048  ;;  %p1441_p6 = scmp.lt.s32.totalorder %s60_s21, %s60_s21 }
  0x2d   :  { %p1437_p5 = scmp.ne.s32.totalorder %s60_s21, %s1436_s2  ;;  %p1442_p7 = scmp.lt.s32.totalorder %s1436_s2, %s1436_s2 }
  0x2f   :  { %p1443_p8 = por %p1442_p7, %p1441_p6 }
  0x31   :  { %p1444_p9 = pnand %p1443_p8, %p1437_p5 }
  0x33   :  { %1447 = shalt.err (!%p1444_p9)
}
  0x34   :  { %65 = dma.hbm_to_vmem [thread:$0]  %s1841_s8, 2048, %s60_s21, [#allocation5], %s1477_s23, %s1477_s23, %s1478_s24  }
  0x35   :  { %s1448_s18 = scalar_lea.hbm %s1842_s9, 512 }
  0x36   :  { %p1449_p10 = scmp.ne.s32.totalorder %s1842_s9, %s1448_s18  ;;  %p1452_p11 = scmp.lt.u32.totalorder %s1448_s18, %s1842_s9 }
  0x38   :  { %p1454_p12 = pnand %p1452_p11, %p1449_p10 }
  0x3a   :  { %1457 = shalt.err (!%p1454_p12)
}
  0x3b   :  { %s1458_s27 = scalar_lea.vmem %s1577_s25, 512  ;;  %p1463_p0 = scmp.lt.s32.totalorder %s1577_s25, %s1577_s25 }
  0x3c   :  { %p1459_p13 = scmp.ne.s32.totalorder %s1577_s25, %s1458_s27  ;;  %p1464_p1 = scmp.lt.s32.totalorder %s1458_s27, %s1458_s27 }
  0x3e   :  { %p1465_p2 = por %p1464_p1, %p1463_p0 }
  0x40   :  { %p1466_p3 = pnand %p1465_p2, %p1459_p13 }
  0x42   :  { %1469 = shalt.err (!%p1466_p3)
}
  0x43   :  { %77 = dma.hbm_to_vmem [thread:$0]  %s1842_s9, 512, %s1577_s25, [#allocation8], %s1480_s3, %s1480_s3, %s1481_s14  }
  0x44   :  { %1470 = dma.done.wait [#allocation3], 512  }
  0x45   :  { %1471 = vsyncadd [#allocation3], 4294966784 }
  0x46   :  { %1472 = dma.done.wait [#allocation5], 3072  }
  0x47   :  { %1473 = vsyncadd [#allocation5], 4294964224 }
  0x48   :  { %1474 = dma.done.wait [#allocation8], 512  }
  0x49   :  { %1475 = vsyncadd [#allocation8], 4294966784  ;;  %v1484_v0 = vmov 0.0   ;;  %v1485_v1 = vmov 0   ;;  %v166_v2 = vld [vmem:[#allocation4 + $0x8] sm:$0xff]  ;;  %v168_v3 = vld [vmem:[#allocation4 + $0x18] sm:$0xff]  ;;  %v90_v25 = vlaneseq }
  0x4a   :  { %253 = vmatprep.mubr.f32.mxu0 %v1484_v0  ;;  %1362 = vset.pattern.permute.xlu1 %v1485_v1  ;;  %v165_v4 = vld [vmem:[#allocation4] sm:$0xff]  ;;  %v1258_v5 = vpack.c.bf16 %v168_v3, %v166_v2  ;;  %v167_v6 = vld [vmem:[#allocation4 + $0x10] sm:$0xff]  ;;  %v170_v7 = vld [vmem:[#allocation4 + $0x28] sm:$0xff]  ;;  %vm185_vm0 = vcmask 261120   ;;  %vm370_vm2 = vcmask 523264   ;;  %vm268_vm3 = vcmask 31744  }
  0x4b   :  { %1363 = vset.pattern.permute.xlu0 %v1485_v1  ;;  %v172_v8 = vld [vmem:[#allocation4 + $0x38] sm:$0xff]  ;;  %v1260_v9 = vpack.c.bf16 %v167_v6, %v165_v4  ;;  %v169_v11 = vld [vmem:[#allocation4 + $0x20] sm:$0xff]  ;;  %v171_v12 = vld [vmem:[#allocation4 + $0x30] sm:$0xff]  ;;  %v1649_v28 = vshrl.u32 %v90_v25, 7  ;;  %v1651_v29 = vand.u32 127, %v90_v25  ;;  %vm281_vm5 = vcmask 1043456  }
  0x4c   :  { %v1262_v10 = vpack.c.bf16 %v172_v8, %v170_v7  ;;  %1259 = vmatprep.subr.bf16.mxu0 %v1258_v5  ;;  %v142_v13 = vld [vmem:[%s1833_s0] sm:$0xf]  ;;  %v261_v15 = vld [vmem:[%s1839_s6 + $0x8] sm:$0xff]  ;;  %v1264_v16 = vpack.c.bf16 %v171_v12, %v169_v11  ;;  %v262_v18 = vld [vmem:[%s1839_s6 + $0x10] sm:$0xff]  ;;  %vm1488_vm8 = vmmov 0   ;;  %vm650_vm14 = vcmask 60416  }
  0x4d   :  { %v260_v14 = vld [vmem:[%s1839_s6] sm:$0xff]  ;;  %1261 = vmatpush1.bf16.msra.mxu0 %v1260_v9  ;;  %144 = vperm.xlu1 %1362, %v142_v13   ;;  %v263_v19 = vld [vmem:[%s1839_s6 + $0x18] sm:$0xff]  ;;  %v265_v22 = vld [vmem:[%s1839_s6 + $0x28] sm:$0xff]  ;;  %v95_v31 = vand.u32 3, %v1649_v28  ;;  %v1679_v39 = vadd.s32 8, %v1649_v28  ;;  %v1682_v40 = vadd.s32 16, %v1649_v28 }
  0x4e   :  { %v1266_v17 = vpack.c.bf16 %v261_v15, %v260_v14  ;;  %1263 = vmatprep.subr.bf16.mxu0 %v1262_v10  ;;  %v1270_v20 = vpack.c.bf16 %v263_v19, %v262_v18  ;;  %v264_v21 = vld [vmem:[%s1839_s6 + $0x20] sm:$0xff]  ;;  %v266_v26 = vld [vmem:[%s1839_s6 + $0x30] sm:$0xff]  ;;  %v267_v27 = vld [vmem:[%s1839_s6 + $0x38] sm:$0xff]  ;;  %v177_v41 = vsub.s32 0, %v1649_v28  ;;  %v181_v43 = vsub.s32 1, %v1649_v28  ;;  %s1491_s29 = smov 32  }
  0x4f   :  { %v1639_v23 = vld [vmem:[%s1834_s1] sm:$0xf]  ;;  %v1274_v24 = vpack.c.bf16 %v265_v22, %v264_v21  ;;  %v1278_v30 = vpack.c.bf16 %v267_v27, %v266_v26  ;;  %vm101_vm1 = vcmp.eq.s32.totalorder %v95_v31, %v1651_v29  ;;  %v1658_v34 = vld [vmem:[#allocation2 + $0x8] sm:$0xff]  ;;  %v1667_v36 = vld [vmem:[#allocation2 + $0x10] sm:$0xff]  ;;  %v96_v44 = vand.u32 3, %v1679_v39 }
  0x50   :  { %1267 = vmatprep.subr.bf16.mxu1 %v1266_v17  ;;  %v1655_v32 = vld [vmem:[#allocation2] sm:$0xff]  ;;  %v1101_v33 = vsel %vm101_vm1, 1.0, %v1484_v0  ;;  %v1671_v37 = vld [vmem:[#allocation2 + $0x18] sm:$0xff]  ;;  %v1691_v45 = vadd.s32 24, %v1649_v28  ;;  %v97_v46 = vand.u32 3, %v1682_v40  ;;  %v473_v62 = vld [vmem:[%s1840_s7 + $0x8] sm:$0xff] }
  0x51   :  { %1269 = vmatpush3.bf16.msra.mxu1 %v1266_v17  ;;  %1265 = vmatpush1.bf16.msra.mxu0 %v1264_v16  ;;  %v1297_v35 = vpack.c.bf16 %v1658_v34, %v1655_v32  ;;  %v1300_v38 = vpack.c.bf16 %v1671_v37, %v1667_v36  ;;  %v173_v42 = vld [vmem:[%s1837_s4] sm:$0x3]  ;;  %vm102_vm4 = vcmp.eq.s32.totalorder %v96_v44, %v1651_v29  ;;  %s1486_s4 = smov 64   ;;  %v474_v1 = vld [vmem:[%s1840_s7 + $0x10] sm:$0xff]  ;;  %v475_v2 = vld [vmem:[%s1840_s7 + $0x18] sm:$0xff]  ;;  %v1487_v16 = vmov 0.0|0.0  }
  0x52   :  { %1271 = vmatprep.subr.bf16.mxu1 %v1270_v20  ;;  %1200 = vmatprep.mubr.msk.f32.mxu1 %vm370_vm2, %v1655_v32  ;;  %v178_v47 = vrot.slane %v173_v42, %v177_v41  ;;  %v182_v48 = vrot.slane %v173_v42, %v181_v43  ;;  %v98_v49 = vand.u32 3, %v1691_v45  ;;  %vm103_vm6 = vcmp.eq.s32.totalorder %v97_v46, %v1651_v29  ;;  %v472_v61 = vld [vmem:[%s1840_s7] sm:$0xff] }
  0x53   :  { %v1102_v54 = vsel %vm102_vm4, 1.0, %v1484_v0  ;;  %v1103_v55 = vsel %vm103_vm6, 1.0, %v1484_v0  ;;  %v1282_v63 = vpack.c.bf16 %v473_v62, %v472_v61  ;;  %v1286_v3 = vpack.c.bf16 %v475_v2, %v474_v1  ;;  %v810_v61 = vld [vmem:[#allocation6] sm:$0xff]  ;;  %v815_v1 = vld [vmem:[#allocation6 + $0x28] sm:$0xff]  ;;  %v817_v2 = vld [vmem:[#allocation6 + $0x38] sm:$0xff] }
  0x54   :  { %1112 = vmatmul.mubr.msk.f32.vlgmr.msra.gmra.mrb[0].mxu0 %vm185_vm0, %v1639_v23  ;;  %vm104_vm7 = vcmp.eq.s32.totalorder %v98_v49, %v1651_v29  ;;  %v118_v17 = vshra.s32 %v1679_v39, 2  ;;  %v117_v18 = vshra.s32 %v1649_v28, 2  ;;  %v120_v19 = vshra.s32 %v1691_v45, 2 }
  0x55   :  { %1273 = vmatpush3.bf16.msra.mxu1 %v1270_v20  ;;  %1178 = vmatprep.mubr.msk.f32.mxu0 %vm268_vm3, %v1101_v33  ;;  %v1104_v56 = vsel %vm104_vm7, 1.0, %v1484_v0  ;;  %v119_v20 = vshra.s32 %v1682_v40, 2  ;;  %v113_v33 = vand.u32 3, %v1651_v29  ;;  %vm662_vm1 = vcmask 64512  }
  0x56   :  { %1275 = vmatprep.subr.bf16.mxu1 %v1274_v24  ;;  %vm122_vm9 = vcmp.eq.s32.totalorder %v118_v17, %v1651_v29  ;;  %vm121_vm10 = vcmp.eq.s32.totalorder %v117_v18, %v1651_v29  ;;  %vm124_vm11 = vcmp.eq.s32.totalorder %v120_v19, %v1651_v29  ;;  %v150_v18 = vld [vmem:[%s1838_s5 + $0x8] sm:$0xff]  ;;  %v152_v19 = vld [vmem:[%s1838_s5 + $0x18] sm:$0xff]  ;;  %vm1089_vm4 = vcmask 785408  }
  0x57   :  { %v1107_v21 = vsel %vm122_vm9, 1.0, %v1484_v0  ;;  %v1106_v22 = vsel %vm121_vm10, 1.0, %v1484_v0  ;;  %vm123_vm12 = vcmp.eq.s32.totalorder %v119_v20, %v1651_v29  ;;  %vm114_vm13 = vcmp.eq.s32.totalorder %v113_v33, %v1649_v28 }
  0x58   :  { %v1108_v31 = vsel %vm123_vm12, 1.0, %v1484_v0  ;;  %v1743_v45 = vsel %vm114_vm13, 1.0, %v1484_v0  ;;  %v1318_v20 = vpack.c.bf16 %v152_v19, %v150_v18 }
  0x59   :  { %1277 = vmatpush3.bf16.msra.mxu1 %v1274_v24 }
  0x5a   :  { %1279 = vmatprep.subr.bf16.mxu1 %v1278_v30 }
  0x5d   :  { %1281 = vmatpush3.bf16.msra.mxu1 %v1278_v30  ;;  %v1109_v30 = vsel %vm124_vm11, 1.0, %v1484_v0 }
  0x60   :  { %1201 = vmatmul.mubr.msk.f32.vlgmr.msra.gmra.mrb[0].mxu1 %vm370_vm2, %v1658_v34  ;;  %v1306_v34 = vpack.c.bf16 %v817_v2, %v815_v1 }
  0x61   :  { %1203 = vmatprep.mubr.msk.f32.mxu1 %vm370_vm2, %v1667_v36 }
  0x64   :  { %1204 = vmatmul.mubr.msk.f32.gmra.mrb[2].mxu1 %vm370_vm2, %v1671_v37  ;;  %v818_v37 = vld [vmem:[#allocation6 + $0x40] sm:$0xff] }
  0x65   :  { %893 = vmatprep.mubr.f32.mxu1 %v1484_v0 }
 0x127   :  { %v255_v50 = vpop.f32.mrb[0].mxu0 }
 0x128   :  { %v256_v51 = vadd.f32 %v255_v50, %v178_v47  ;;  %v257_v52 = vpop.f32.mrb[1].mxu0 }
 0x129   :  { %v1697_v53 = vadd.f32 %v257_v52, %v182_v48 }
 0x12a   :  { %1176 = vmatprep.subr.msk.mxu0 %vm281_vm5, %v256_v51 }
 0x12b   :  { %982 = vrot.lane.b32.xlu1 %v1697_v53, %s1486_s4  ;;  %1177 = vmatpush3.msk.msra.mxu0 %vm281_vm5, %v256_v51  ;;  %vm1091_vm5 = vcmask 850944  }
 0x12c   :  { %1179 = vmatmul.mubr.msk.f32.vlgmr.msra.gmra.mrb[2].mxu0 %vm268_vm3, %v1102_v54  ;;  %1283 = vmatprep.subr.bf16.mxu0 %v1282_v63 }
 0x12d   :  { %1181 = vmatprep.mubr.msk.f32.mxu0 %vm268_vm3, %v1103_v55  ;;  %1285 = vmatpush3.bf16.msra.mxu0 %v1282_v63  ;;  %v133_v55 = vshra.s32 %v1651_v29, 2  ;;  %v812_v63 = vld [vmem:[#allocation6 + $0x10] sm:$0xff] }
 0x12e   :  { %1287 = vmatprep.subr.bf16.mxu0 %v1286_v3  ;;  %v1304_v32 = vpack.c.bf16 %v812_v63, %v810_v61 }
 0x12f   :  { %vm134_vm15 = vcmp.eq.s32.totalorder %v133_v55, %v1649_v28  ;;  %v811_v28 = vld [vmem:[#allocation6 + $0x8] sm:$0xff] }
 0x130   :  { %1182 = vmatmul.mubr.msk.f32.gmra.mrb[4].mxu0 %vm268_vm3, %v1104_v56  ;;  %v1489_v56 = vmov 1.0  }
 0x131   :  { %1289 = vmatpush3.bf16.msra.mxu0 %v1286_v3  ;;  %v816_v3 = vld [vmem:[#allocation6 + $0x30] sm:$0xff] }
 0x132   :  { %1290 = vmatprep.subr.bf16.mxu0 %v1487_v16 }
 0x133   :  { %v1202_v57 = vpop.f32.mrb[0].mxu1 }
 0x134   :  { %v449_v58 = vpop.f32.mrb[1].mxu1 }
 0x137   :  { %v1205_v59 = vpop.f32.mrb[2].mxu1 }
 0x138   :  { %v459_v60 = vpop.f32.mrb[3].mxu1 }
 0x1ff   :  { %v1180_v4 = vpop.f32.mrb[2].mxu0 }
 0x200   :  { %v455_v5 = vadd.f32 %v1202_v57, %v1180_v4  ;;  %v351_v6 = vpop.f32.mrb[3].mxu0  ;;  %v819_v4 = vld [vmem:[#allocation6 + $0x48] sm:$0xff] }
 0x201   :  { %v450_v7 = vadd.f32 %v449_v58, %v351_v6 }
 0x203   :  { %1364 = vtanh.f32 %v450_v7  ;;  %v1183_v8 = vpop.f32.mrb[4].mxu0  ;;  %v823_v7 = vld [vmem:[#allocation6 + $0x68] sm:$0xff] }
 0x204   :  { %1366 = vtanh.f32 %v455_v5  ;;  %v465_v9 = vadd.f32 %v1205_v59, %v1183_v8  ;;  %v361_v10 = vpop.f32.mrb[5].mxu0  ;;  %v821_v5 = vld [vmem:[#allocation6 + $0x58] sm:$0xff] }
 0x205   :  { %v460_v11 = vadd.f32 %v459_v60, %v361_v10  ;;  %v813_v60 = vld [vmem:[#allocation6 + $0x18] sm:$0xff]  ;;  %v1310_v36 = vpack.c.bf16 %v821_v5, %v819_v4 }
 0x206   :  { %v1302_v62 = vpack.c.bf16 %v813_v60, %v811_v28  ;;  %v825_v8 = vld [vmem:[#allocation6 + $0x78] sm:$0xff] }
 0x207   :  { %1368 = vtanh.f32 %v460_v11  ;;  %v1314_v10 = vpack.c.bf16 %v825_v8, %v823_v7  ;;  %v822_v11 = vld [vmem:[#allocation6 + $0x60] sm:$0xff] }
 0x208   :  { %1370 = vtanh.f32 %v465_v9  ;;  %1303 = vmatprep.subr.bf16.mxu1 %v1302_v62 }
 0x209   :  { %1305 = vmatpush1.bf16.msra.mxu1 %v1304_v32  ;;  %v1003_v32 = vld [vmem:[#allocation7] sm:$0xff] }
 0x20a   :  { %1307 = vmatprep.subr.bf16.mxu1 %v1306_v34  ;;  %v1004_v34 = vld [vmem:[#allocation7 + $0x8] sm:$0xff] }
 0x20d   :  { %v1365_v12 = vpop.eup %1364 }
 0x20e   :  { %v1367_v13 = vpop.eup %1366  ;;  %1214 = vmatprep.mubr.msk.f32.mxu0 %vm185_vm0, %v1365_v12  ;;  %v824_v12 = vld [vmem:[#allocation6 + $0x70] sm:$0xff] }
 0x20f   :  { %1215 = vmatmul.mubr.msk.f32.vlgmr.msra.gmra.mrb[6].mxu0 %vm185_vm0, %v1367_v13  ;;  %v1316_v13 = vpack.c.bf16 %v824_v12, %v822_v11 }
 0x211   :  { %v1369_v14 = vpop.eup %1368 }
 0x212   :  { %v1371_v15 = vpop.eup %1370  ;;  %1217 = vmatprep.mubr.msk.f32.mxu0 %vm185_vm0, %v1369_v14 }
 0x213   :  { %1218 = vmatmul.mubr.msk.f32.gmra.mrb[8].mxu0 %vm185_vm0, %v1371_v15 }
 0x214   :  { %1228 = vmatprep.mubr.msk.f32.mxu0 %vm1488_vm8, %v1484_v0 }
 0x2e2   :  { %v1216_v24 = vpop.f32.mrb[6].mxu0 }
 0x2e3   :  { %v574_v25 = vmul.f32 %v1216_v24, %v1107_v21  ;;  %v554_v26 = vpop.f32.mrb[7].mxu0  ;;  %v149_v21 = vld [vmem:[%s1838_s5] sm:$0xff]  ;;  %v154_v24 = vld [vmem:[%s1838_s5 + $0x28] sm:$0xff] }
 0x2e4   :  { %v573_v27 = vmul.f32 %v1106_v22, %v554_v26  ;;  %v151_v22 = vld [vmem:[%s1838_s5 + $0x10] sm:$0xff] }
 0x2e5   :  { %v1320_v26 = vpack.c.bf16 %v151_v22, %v149_v21 }
 0x2e6   :  { %v1291_v39 = vpack.c.bf16 %v574_v25, %v573_v27  ;;  %v1219_v40 = vpop.f32.mrb[8].mxu0  ;;  %v156_v25 = vld [vmem:[%s1838_s5 + $0x38] sm:$0xff] }
 0x2e7   :  { %v576_v41 = vmul.f32 %v1219_v40, %v1109_v30  ;;  %v564_v42 = vpop.f32.mrb[9].mxu0  ;;  %v1322_v27 = vpack.c.bf16 %v156_v25, %v154_v24  ;;  %v153_v30 = vld [vmem:[%s1838_s5 + $0x20] sm:$0xff]  ;;  %v160_v40 = vld [vmem:[%s1838_s5 + $0x58] sm:$0xff] }
 0x2e8   :  { %v575_v43 = vmul.f32 %v1108_v31, %v564_v42  ;;  %1292 = vmatpush3.bf16.msra.mxu0 %v1291_v39  ;;  %v155_v31 = vld [vmem:[%s1838_s5 + $0x30] sm:$0xff]  ;;  %v158_v39 = vld [vmem:[%s1838_s5 + $0x48] sm:$0xff] }
 0x2e9   :  { %1293 = vmatprep.subr.bf16.mxu0 %v1487_v16  ;;  %v1324_v42 = vpack.c.bf16 %v155_v31, %v153_v30 }
 0x2ea   :  { %v1294_v44 = vpack.c.bf16 %v576_v41, %v575_v43  ;;  %v1326_v43 = vpack.c.bf16 %v160_v40, %v158_v39 }
 0x2ec   :  { %1295 = vmatpush3.bf16.msra.mxu0 %v1294_v44  ;;  %v157_v44 = vld [vmem:[%s1838_s5 + $0x40] sm:$0xff] }
 0x2ed   :  { %1231 = vmatprep.subr.mxu0 %v1484_v0 }
 0x2ef   :  { %1229 = vmatmul.mubr.msk.f32.vlgmr.msra.gmra.mrb[10].mxu0 %vm185_vm0, %v1743_v45 }
 0x2f0   :  { %1233 = vmatprep.mubr.msk.f32.mxu0 %vm1488_vm8, %v1484_v0  ;;  %1232 = vmatpush3.msk.msra.mxu0 %vm134_vm15, %v1489_v56 }
 0x2f1   :  { %1296 = vmatprep.subr.bf16.mxu0 %v1487_v16 }
 0x3c2   :  { %v646_v46 = vpop.f32.mrb[10].mxu0 }
 0x3c3   :  { %v651_v47 = vsel %vm650_vm14, %v646_v46, -inf  ;;  %v1230_v48 = vpop.f32.mrb[11].mxu0 }
 0x3c4   :  { %652 = vmax.xlane.f32.xlu0 %v651_v47  ;;  %v164_v47 = vld [vmem:[%s1838_s5 + $0x78] sm:$0xff] }
 0x451   :  { %v653_v49 = vpop.xlane.xlu0 %652 }
 0x452   :  { %v654_v50 = vsub.f32 %v646_v46, %v653_v49  ;;  %v162_v46 = vld [vmem:[%s1838_s5 + $0x68] sm:$0xff] }
 0x453   :  { %v1330_v49 = vpack.c.bf16 %v164_v47, %v162_v46 }
 0x454   :  { %v655_v51 = vmul.f32 1.442695, %v654_v50  ;;  %v161_v50 = vld [vmem:[%s1838_s5 + $0x60] sm:$0xff] }
 0x456   :  { %1372 = vpow2.f32 %v655_v51  ;;  %v163_v51 = vld [vmem:[%s1838_s5 + $0x70] sm:$0xff] }
 0x460   :  { %v1373_v52 = vpop.eup %1372 }
 0x461   :  { %v657_v54 = vsel %vm650_vm14, %v1373_v52, 0.0 }
 0x462   :  { %658 = vadd.xlane.f32.xlu0 %v657_v54  ;;  %v1332_v54 = vpack.c.bf16 %v163_v51, %v161_v50 }
 0x4ef   :  { %v659_v57 = vpop.xlane.xlu0 %658 }
 0x4f0   :  { %1374 = vrcp.f32 %v659_v57 }
 0x4fa   :  { %v1375_v58 = vpop.eup %1374 }
 0x4fb   :  { %v1753_v59 = vmul.f32 %v1375_v58, %v1373_v52  ;;  %v145_v52 = vpop.permute.xlu1 %144 }
 0x4fc   :  { %vm146_vm3 = vcmp.eq.s32.totalorder %v1651_v29, %v145_v52 }
 0x4fd   :  { %1234 = vmatmul.mubr.msk.f32.vlgmr.msra.gmra.mrb[12].mxu0 %vm662_vm1, %v1753_v59  ;;  %v1111_v55 = vsel %vm146_vm3, 1.0, %v1484_v0 }
 0x4fe   :  { %1298 = vmatpush3.bf16.msra.mxu0 %v1297_v35  ;;  %1244 = vmatprep.mubr.msk.f32.mxu0 %vm1488_vm8, %v1484_v0  ;;  %v814_v35 = vld [vmem:[#allocation6 + $0x20] sm:$0xff] }
 0x4ff   :  { %1299 = vmatprep.subr.bf16.mxu0 %v1487_v16  ;;  %v1308_v6 = vpack.c.bf16 %v816_v3, %v814_v35  ;;  %v983_v63 = vpop.permute.xlu1 %982  ;;  %v1335_v35 = vpack.c.bf16 %v1004_v34, %v1003_v32  ;;  %v1006_v3 = vld [vmem:[#allocation7 + $0x18] sm:$0xff] }
 0x501   :  { %1309 = vmatpush1.bf16.msra.mxu1 %v1308_v6 }
 0x502   :  { %1301 = vmatpush3.bf16.msra.mxu0 %v1300_v38  ;;  %v820_v38 = vld [vmem:[#allocation6 + $0x50] sm:$0xff]  ;;  %1311 = vmatprep.subr.bf16.mxu1 %v1310_v36 }
 0x503   :  { %1334 = vmatprep.subr.bf16.mxu0 %v1487_v16  ;;  %v1312_v9 = vpack.c.bf16 %v820_v38, %v818_v37 }
 0x505   :  { %1313 = vmatpush1.bf16.msra.mxu1 %v1312_v9 }
 0x506   :  { %1315 = vmatprep.subr.bf16.mxu1 %v1314_v10 }
 0x509   :  { %1317 = vmatpush1.bf16.msra.mxu1 %v1316_v13 }
 0x50a   :  { %1319 = vmatprep.subr.bf16.mxu1 %v1318_v20 }
 0x5d0   :  { %v732_v14 = vpop.f32.mrb[12].mxu0 }
 0x5d1   :  { %v736_v15 = vmul.f32 %v1743_v45, %v732_v14  ;;  %v1235_v17 = vpop.f32.mrb[13].mxu0  ;;  %v159_v45 = vld [vmem:[%s1838_s5 + $0x50] sm:$0xff]  ;;  %s1490_s5 = smov 96  }
 0x5d2   :  { %v1328_v48 = vpack.c.bf16 %v159_v45, %v157_v44 }
 0x5d3   :  { %1245 = vmatmul.mubr.msk.f32.vlgmr.msra.gmra.mrb[14].mxu0 %vm185_vm0, %v736_v15 }
 0x5d4   :  { %1255 = vmatprep.mubr.msk.f32.mxu0 %vm1488_vm8, %v1484_v0  ;;  %1336 = vmatpush3.bf16.msra.mxu0 %v1335_v35 }
 0x5d5   :  { %1337 = vmatprep.subr.bf16.mxu0 %v1487_v16 }
 0x6a6   :  { %v806_v33 = vpop.f32.mrb[14].mxu0 }
 0x6a7   :  { %v1246_v41 = vpop.f32.mrb[15].mxu0  ;;  %1130 = vmatmul.mubr.msk.f32.vlgmr.msra.gmra.mrb[4].mxu1 %vm370_vm2, %v806_v33 }
 0x6a8   :  { %1321 = vmatpush1.bf16.msra.mxu1 %v1320_v26  ;;  %967 = vmatprep.mubr.f32.mxu1 %v1484_v0 }
 0x6a9   :  { %1323 = vmatprep.subr.bf16.mxu1 %v1322_v27 }
 0x6ac   :  { %1325 = vmatpush1.bf16.msra.mxu1 %v1324_v42 }
 0x6ad   :  { %1327 = vmatprep.subr.bf16.mxu1 %v1326_v43 }
 0x6b0   :  { %1329 = vmatpush1.bf16.msra.mxu1 %v1328_v48 }
 0x6b1   :  { %1331 = vmatprep.subr.bf16.mxu1 %v1330_v49 }
 0x6b4   :  { %1333 = vmatpush1.bf16.msra.mxu1 %v1332_v54 }
 0x6b7   :  { %1131 = vmatmul.mubr.msk.f32.vlgmr.msra.gmra.mrb[4].mxu1 %vm370_vm2, %v1111_v55 }
 0x78a   :  { %v969_v56 = vpop.f32.mrb[4].mxu1 }
 0x78b   :  { %v974_v57 = vadd.f32 %v969_v56, %v1697_v53  ;;  %v971_v58 = vpop.f32.mrb[5].mxu1  ;;  %v1005_v53 = vld [vmem:[#allocation7 + $0x10] sm:$0xff] }
 0x78c   :  { %v1338_v4 = vpack.c.bf16 %v1006_v3, %v1005_v53 }
 0x78d   :  { %v1132_v28 = vmul.f32 -1.442695, %v974_v57 }
 0x78e   :  { %1339 = vmatpush3.bf16.msra.mxu0 %v1338_v4 }
 0x78f   :  { %1376 = vpow2.f32 %v1132_v28 }
 0x799   :  { %v1377_v60 = vpop.eup %1376 }
 0x79a   :  { %v978_v61 = vadd.f32 1.0, %v1377_v60 }
 0x79c   :  { %1378 = vrcp.f32 %v978_v61 }
 0x7a6   :  { %v1379_v62 = vpop.eup %1378 }
 0x7a7   :  { %v985_v1 = vmul.f32 %v1379_v62, %v983_v63  ;;  %v992_v6 = vsub.f32 1.0, %v1379_v62 }
 0x7a9   :  { %987 = vrot.lane.b32.xlu0 %v985_v1, %s1486_s4 }
 0x81b   :  { %v988_v29 = vpop.permute.xlu0 %987 }
 0x81c   :  { %v990_v2 = vadd.f32 %v988_v29, %v969_v56 }
 0x81e   :  { %1380 = vtanh.f32 %v990_v2 }
 0x828   :  { %v1381_v0 = vpop.eup %1380 }
 0x829   :  { %994 = vrot.lane.b32.xlu1 %v1381_v0, %s1490_s5 }
 0x82d   :  { %998 = vrot.lane.b32.xlu1 %v1639_v23, %s1491_s29 }
 0x89b   :  { %v995_v5 = vpop.permute.xlu1 %994 }
 0x89c   :  { %v997_v37 = vmul.f32 %v995_v5, %v992_v6 }
 0x89f   :  { %v999_v36 = vpop.permute.xlu1 %998 }
 0x8a0   :  { %v1001_v38 = vmul.f32 %v1379_v62, %v999_v36 }
 0x8a2   :  { %v1002_v7 = vadd.f32 %v1001_v38, %v997_v37 }
 0x8a4   :  { %1008 = vrot.lane.b32.xlu1 %v1002_v7, %s1490_s5 }
 0x8a8   :  { %1082 = vrot.lane.b32.xlu1 %v1002_v7, %s1491_s29 }
 0x8ac   :  { %1085 = vrot.lane.b32.xlu1 %v1753_v59, %s1490_s5 }
 0x916   :  { %v1009_v8 = vpop.permute.xlu1 %1008 }
 0x917   :  { %1256 = vmatmul.mubr.msk.f32.vlgmr.msra.gmra.mrb[16].mxu0 %vm185_vm0, %v1009_v8 }
 0x91a   :  { %v1083_v23 = vpop.permute.xlu1 %1082 }
 0x91e   :  { %v1086_v16 = vpop.permute.xlu1 %1085 }
 0x9ea   :  { %v1078_v9 = vpop.f32.mrb[16].mxu0 }
 0x9eb   :  { %v1079_v10 = vadd.f32 %v1078_v9, %v971_v58  ;;  %v1257_v11 = vpop.f32.mrb[17].mxu0 }
 0x9ed   :  { %v1088_v12 = vsel %vm370_vm2, %v1079_v10, %v1083_v23 }
 0x9ee   :  { %v1090_v13 = vsel %vm1089_vm4, %v1088_v12, %v1086_v16 }
 0x9ef   :  { %v1092_v14 = vsel %vm1091_vm5, %v1090_v13, 0.0 }
 0x9f0   :  { %1093 = vst [vmem:[%s1843_s10] sm:$0xf] %v1092_v14 }
 0x9f1   :  { %1098 = vsyncpa [#allocation3], 1 }
 0x9f2   :  { %1099 = vsyncpa [#allocation5], 1 }
 0x9f3   :  { %1100 = vsyncpa [#allocation8], 1 }

</bundles_post_ra>
